<compile_context>
chip_gen: v7x
topology: tpu7x:2x2x1
jax: 0.10.0
libtpu: 0.0.40
codegen_flags: <defaults>
</compile_context>

<pallas_src>
import functools
import math

import jax
import jax.numpy as jnp
from jax.experimental import pallas as pl
from jax.experimental.pallas import tpu as pltpu


def _round_up(a, m):
    return (a + m - 1) // m * m


# --------------------------------------------------------------------------- #
# Fast path: whole L fits in one tile -> single reduce, no scratch.
# --------------------------------------------------------------------------- #
def _pool_single_kernel(x_ref, max_ref, avg_ref, *, inv_length):
    x = x_ref[...].astype(jnp.float32)
    max_ref[...] = jnp.max(x, axis=-1, keepdims=True).astype(max_ref.dtype)
    avg_ref[...] = (jnp.sum(x, axis=-1, keepdims=True)
                    * inv_length).astype(avg_ref.dtype)


# --------------------------------------------------------------------------- #
# Chunked path: L split across an inner "arbitrary" grid axis with f32
# running-max / running-sum scratch.
# --------------------------------------------------------------------------- #
def _pool_chunked_kernel(x_ref, max_ref, avg_ref, max_acc, sum_acc, *,
                         length, l_chunk, needs_mask):
    k = pl.program_id(1)
    last = pl.num_programs(1) - 1

    @pl.when(k == 0)
    def _init():
        max_acc[...] = jnp.full(max_acc.shape, -jnp.inf, dtype=max_acc.dtype)
        sum_acc[...] = jnp.zeros(sum_acc.shape, dtype=sum_acc.dtype)

    x = x_ref[...].astype(jnp.float32)

    def _accumulate(x_for_max, x_for_sum):
        max_acc[...] = jnp.maximum(
            max_acc[...], jnp.max(x_for_max, axis=-1, keepdims=True))
        sum_acc[...] = sum_acc[...] + jnp.sum(x_for_sum, axis=-1, keepdims=True)

    if needs_mask:
        # Only the trailing L-chunk contains out-of-bounds garbage lanes; keep
        # every other chunk a pure load/reduce (no iota/compare/select).
        @pl.when(k != last)
        def _full_chunk():
            _accumulate(x, x)

        @pl.when(k == last)
        def _tail_chunk():
            lane = jax.lax.broadcasted_iota(jnp.int32, x.shape, 1)
            valid = (k * l_chunk + lane) < length
            _accumulate(jnp.where(valid, x, -jnp.inf),
                        jnp.where(valid, x, 0.0))
    else:
        _accumulate(x, x)

    @pl.when(k == last)
    def _finalize():
        max_ref[...] = max_acc[...].astype(max_ref.dtype)
        avg_ref[...] = (sum_acc[...] * (1.0 / length)).astype(avg_ref.dtype)


# --------------------------------------------------------------------------- #
# Tile selection.
# --------------------------------------------------------------------------- #
def _choose_tiles(n_rows, length, itemsize):
    """Pick (row_block, l_chunk). Keep a single input buffer around ~2 MiB so
    double-buffering fits comfortably in every generation's scoped VMEM
    (v7x only has 64 MiB total)."""
    target = 2 * 1024 * 1024                      # bytes per input buffer
    row_align = max(8, 32 // itemsize)            # f32:8, bf16:16, int8/fp8:32

    if 8 * length * itemsize > target:
        # Even a minimal 8-row tile at full L blows the budget -> chunk L.
        l_chunk = max(128, (target // (8 * itemsize)) // 128 * 128)
        l_chunk = min(l_chunk, 2048)
    else:
        l_chunk = length                          # full L in one tile

    rows = (target // max(l_chunk * itemsize, 1)) // row_align * row_align
    rows = max(row_align, min(rows, 1024))
    rows = min(rows, _round_up(n_rows, row_align))

    # Prefer >=2 row blocks so the "parallel" axis can feed both v7x
    # TensorCores and the pipeline has more than one step to overlap.
    if rows >= _round_up(n_rows, row_align) and n_rows >= 2 * row_align:
        rows = max(row_align, _round_up(pl.cdiv(n_rows, 2), row_align))

    return rows, l_chunk


# --------------------------------------------------------------------------- #
# Public wrapper: mirrors POOL.forward.
# --------------------------------------------------------------------------- #
def pool_forward(x, *, tile_override=None):
    """Reproduces POOL.forward: squeeze, then (max, mean) over the last dim.
    Returns (x_max, x_avg), each shaped squeeze(x).shape[:-1] + (1,).
    `tile_override=(rows, l_chunk)` is for testing the chunked path at small
    sizes; leave None for production."""
    y = jnp.squeeze(x)                            # mirrors torch.squeeze(x)
    if y.ndim == 1:                               # degenerate: treat as (1, L)
        y = y[None, :]
    assert y.ndim >= 2, f"expected squeezed rank >= 2, got shape {y.shape}"

    lead_shape = y.shape[:-1]
    length = y.shape[-1]
    n_rows = math.prod(lead_shape)
    flat = y.reshape(n_rows, length)              # contiguous reshape: free

    if tile_override is None:
        rows, l_chunk = _choose_tiles(n_rows, length, flat.dtype.itemsize)
    else:
        rows, l_chunk = tile_override

    n_row_blocks = pl.cdiv(n_rows, rows)
    n_l_chunks = pl.cdiv(length, l_chunk)
    needs_mask = (length % l_chunk) != 0

    out_shapes = (
        jax.ShapeDtypeStruct((n_rows, 1), flat.dtype),
        jax.ShapeDtypeStruct((n_rows, 1), flat.dtype),
    )

    if n_l_chunks == 1:
        # Fast path: one tile covers the whole reduction -> no scratch, 1-D grid.
        kernel = functools.partial(_pool_single_kernel, inv_length=1.0 / length)
        grid_spec = pltpu.PrefetchScalarGridSpec(
            num_scalar_prefetch=0,
            grid=(n_row_blocks,),
            in_specs=[pl.BlockSpec((rows, length), lambda i: (i, 0))],
            out_specs=[
                pl.BlockSpec((rows, 1), lambda i: (i, 0)),
                pl.BlockSpec((rows, 1), lambda i: (i, 0)),
            ],
        )
        dim_sem = ("parallel",)
    else:
        kernel = functools.partial(_pool_chunked_kernel, length=length,
                                   l_chunk=l_chunk, needs_mask=needs_mask)
        grid_spec = pltpu.PrefetchScalarGridSpec(
            num_scalar_prefetch=0,
            grid=(n_row_blocks, n_l_chunks),
            in_specs=[pl.BlockSpec((rows, l_chunk), lambda i, k: (i, k))],
            out_specs=[
                pl.BlockSpec((rows, 1), lambda i, k: (i, 0)),
                pl.BlockSpec((rows, 1), lambda i, k: (i, 0)),
            ],
            scratch_shapes=[
                pltpu.VMEM((rows, 1), jnp.float32),   # running max
                pltpu.VMEM((rows, 1), jnp.float32),   # running sum
            ],
        )
        dim_sem = ("parallel", "arbitrary")

    x_max, x_avg = pl.pallas_call(
        kernel,
        out_shape=out_shapes,
        grid_spec=grid_spec,
        compiler_params=pltpu.CompilerParams(
            dimension_semantics=dim_sem,
            vmem_limit_bytes=32 * 1024 * 1024,
        ),
    )(flat)

    out_shape = lead_shape + (1,)
    return x_max.reshape(out_shape), x_avg.reshape(out_shape)


if __name__ == "__main__":
    key = jax.random.PRNGKey(0)
    k1, k2, k3, k4 = jax.random.split(key, 4)

    # Case 1: trailing singleton dim, f32: (2, 8, 128, 1) -> squeeze -> (2, 8, 128)
    x1 = jax.random.normal(k1, (2, 8, 128, 1), dtype=jnp.float32)
    m1, a1 = pool_forward(x1)
    jax.block_until_ready((m1, a1))
    y1 = jnp.squeeze(x1)
    assert m1.shape == (2, 8, 1) and a1.shape == (2, 8, 1)
    assert jnp.allclose(m1, jnp.max(y1, axis=-1, keepdims=True), atol=1e-6)
    assert jnp.allclose(a1, jnp.mean(y1, axis=-1, keepdims=True), atol=1e-6)

    # Case 2: batch of 1 squeezes to rank 2, odd sizes: (1, 10, 200) -> (10, 200)
    x2 = jax.random.normal(k2, (1, 10, 200), dtype=jnp.float32)
    m2, a2 = pool_forward(x2)
    jax.block_until_ready((m2, a2))
    y2 = jnp.squeeze(x2)
    assert m2.shape == (10, 1) and a2.shape == (10, 1)
    assert jnp.allclose(m2, jnp.max(y2, axis=-1, keepdims=True), atol=1e-6)
    assert jnp.allclose(a2, jnp.mean(y2, axis=-1, keepdims=True), atol=1e-6)

    # Case 3: bf16 input exercises the in-kernel f32 accumulation / cast path.
    x3 = jax.random.normal(k3, (2, 16, 256), dtype=jnp.bfloat16)
    m3, a3 = pool_forward(x3)
    jax.block_until_ready((m3, a3))
    y3 = jnp.squeeze(x3).astype(jnp.float32)
    assert m3.shape == (2, 16, 1) and a3.shape == (2, 16, 1)
    assert jnp.allclose(m3.astype(jnp.float32),
                        jnp.max(y3, axis=-1, keepdims=True), atol=1e-2, rtol=1e-2)
    assert jnp.allclose(a3.astype(jnp.float32),
                        jnp.mean(y3, axis=-1, keepdims=True), atol=1e-2, rtol=1e-2)

    # Case 4: force the chunked + tail-mask path at small sizes
    # (L = 200 split into 128-lane chunks, scratch accumulators, pl.when init/finalize).
    x4 = jax.random.normal(k4, (1, 10, 200), dtype=jnp.float32)
    m4, a4 = pool_forward(x4, tile_override=(16, 128))
    jax.block_until_ready((m4, a4))
    y4 = jnp.squeeze(x4)
    assert m4.shape == (10, 1) and a4.shape == (10, 1)
    assert jnp.allclose(m4, jnp.max(y4, axis=-1, keepdims=True), atol=1e-6)
    assert jnp.allclose(a4, jnp.mean(y4, axis=-1, keepdims=True), atol=1e-5)

    print("KERNEL_OK")
</pallas_src>

<mosaic_0001>
module attributes {stable_mosaic.version = 11 : i64} {
  func.func @_pool_single_kernel(%arg0: i32, %arg1: memref<8x128xf32, #tpu.memory_space<vmem>>, %arg2: memref<8x1xf32, #tpu.memory_space<vmem>>, %arg3: memref<8x1xf32, #tpu.memory_space<vmem>>) attributes {dimension_semantics = [#tpu.dimension_semantics<parallel>], iteration_bounds = array<i64: 2>, scalar_prefetch = 0 : i64, scratch_operands = 0 : i64, tpu.core_type = #tpu.core_type<tc>, window_params = [{transform_indices = @transform_0, window_bounds = array<i64: 8, 128>}, {transform_indices = @transform_1, window_bounds = array<i64: 8, 1>}, {transform_indices = @transform_2, window_bounds = array<i64: 8, 1>}]} {
    %c0 = arith.constant 0 : index
    %c0_0 = arith.constant 0 : index
    %0 = vector.load %arg1[%c0, %c0_0] : memref<8x128xf32, #tpu.memory_space<vmem>>, vector<8x128xf32>
    %cst = arith.constant dense<0xFF800000> : vector<8xf32>
    %1 = vector.multi_reduction <maximumf>, %0, %cst [1] : vector<8x128xf32> to vector<8xf32>
    %2 = vector.shape_cast %1 : vector<8xf32> to vector<8x1xf32>
    %c0_1 = arith.constant 0 : index
    %c0_2 = arith.constant 0 : index
    %3 = vector.load %arg2[%c0_1, %c0_2] : memref<8x1xf32, #tpu.memory_space<vmem>>, vector<8x1xf32>
    tpu.vector_store %arg2[%c0_1, %c0_2], %2 {strides = array<i32>} : memref<8x1xf32, #tpu.memory_space<vmem>>, vector<8x1xf32>,
    %cst_3 = arith.constant dense<0.000000e+00> : vector<8xf32>
    %4 = vector.multi_reduction <add>, %0, %cst_3 [1] : vector<8x128xf32> to vector<8xf32>
    %5 = vector.shape_cast %4 : vector<8xf32> to vector<8x1xf32>
    %cst_4 = arith.constant 7.812500e-03 : f32
    %6 = vector.broadcast %cst_4 : f32 to vector<8x1xf32>
    %7 = arith.mulf %5, %6 : vector<8x1xf32>
    %c0_5 = arith.constant 0 : index
    %c0_6 = arith.constant 0 : index
    %8 = vector.load %arg3[%c0_5, %c0_6] : memref<8x1xf32, #tpu.memory_space<vmem>>, vector<8x1xf32>
    tpu.vector_store %arg3[%c0_5, %c0_6], %7 {strides = array<i32>} : memref<8x1xf32, #tpu.memory_space<vmem>>, vector<8x1xf32>,
    return
  }
  func.func @transform_0(%arg0: i32) -> (i32, i32) {
    %c0_i32 = arith.constant 0 : i32
    %c0_i32_0 = arith.constant 0 : i32
    return %arg0, %c0_i32 : i32, i32
  }
  func.func @transform_1(%arg0: i32) -> (i32, i32) {
    %c0_i32 = arith.constant 0 : i32
    %c0_i32_0 = arith.constant 0 : i32
    return %arg0, %c0_i32 : i32, i32
  }
  func.func @transform_2(%arg0: i32) -> (i32, i32) {
    %c0_i32 = arith.constant 0 : i32
    %c0_i32_0 = arith.constant 0 : i32
    return %arg0, %c0_i32 : i32, i32
  }
}

</mosaic_0001>

<bundles_post_ra>
// kernel: tpu_custom_call.1
= control target key start
LH: loop header
LB: loop body
LE: loop exit
PB: predicated region body
PF: predicated region fallthrough
CT: control target
= control target key end

     0   :  { %8 = vsyncpa [#allocation3], 0  ;;  %s517_s0 = inlined_call_operand.hbm [shape: f32[16,128], index: 0, kind: input, shape index: {}]   ;;  %s518_s1 = inlined_call_operand.vmem [shape: f32[16,1], index: 1, kind: output, shape index: {0}]   ;;  %s519_s2 = inlined_call_operand.vmem [shape: f32[16,1], index: 2, kind: output, shape index: {1}]  }
   0x1   :  { %10 = vsyncpa [#allocation3 + $0x1], 0  ;;  %s407_s9 = smov 0   ;;  %s409_s10 = smov 0  }
   0x2   :  { %s411_s11 = smov 0   ;;  %s413_s12 = smov 0  }
   0x3 LB: > { %s426_s13 = sadd.s32 4294967295, %s389_s12   ;;  %s429_s14 = sadd.s32 1, %s389_s12   ;;  %s389_s12 = sphi %s413_s12, %s527_s12   ;;  %s385_s11 = sphi %s411_s11, %s526_s11   ;;  %s381_s10 = sphi %s409_s10, %s525_s10   ;;  %s377_s9 = sphi %s407_s9, %s524_s9  }
   0x4   : > { %s20_s15 = ssub.s32 %s389_s12, %s429_s14  ;;  %s23_s16 = sadd.s32 1, %s385_s11 }
   0x5   : > { %p21_p0 = scmp.eq.s32.totalorder %s20_s15, 0  ;;  %p30_p1 = scmp.ne.s32.totalorder %s385_s11, %s381_s10 }
   0x6   : > { %p31_p2 = scmp.eq.s32.totalorder %s389_s12, 0  ;;  %p36_p3 = scmp.ne.s32.totalorder %s381_s10, %s377_s9 }
   0x7   : > { %s439_s17 = scalar_select %p21_p0, %s385_s11, %s23_s16  }
   0x8   : > { %p32_p4 = por %p31_p2, %p30_p1  ;;  %p37_p5 = scmp.eq.s32.totalorder %s426_s13, 0 }
   0x9   : > { %p292_p6 = scmp.lt.s32.totalorder %s389_s12, 2  ;;  %s112_s19 = sand.u32 1, %s385_s11  }
   0xa   : > { %p443_p7 = por %p37_p5, %p36_p3  ;;  %s278_s20 = sshll.u32 %s112_s19, 3 }
   0xb   : > { %s279_s21 = sshll.u32 %s389_s12, 7  ;;  %s116_s25 = scalar_lea.vmem [#allocation2], %s278_s20 }
   0xc   : > { %s452_s24 = scalar_lea.hbm %s517_s0, %s279_s21  ;;  %s123_s26 = sshll.u32 %s116_s25, 4  ;;  %s454_s26 = int_to_ptr.vmem [resolvable:$true] %s123_s26 }
   0xd   : > { %p456_p8 = pnand %p292_p6, %p32_p4  ;;  %s113_s28 = scalar_lea.sflag [#allocation3], %s112_s19 }
   0xe   : > { %s325_s29 = scalar_lea.hbm %s452_s24, 128  ;;  %s330_s4 = scalar_lea.hbm %s517_s0, 256 }
   0xf   : > { %p326_p11 = scmp.ne.s32.totalorder %s452_s24, %s325_s29  ;;  %p327_p12 = pneg %p456_p8 }
  0x10   : > { %p331_p1 = scmp.lt.u32.totalorder %s452_s24, %s517_s0  ;;  %p332_p2 = scmp.lt.u32.totalorder %s330_s4, %s325_s29 }
  0x11   : > { %p328_p13 = pnand %p327_p12, %p326_p11  ;;  %p334_p4 = scmp.lt.u32.totalorder %s325_s29, %s452_s24 }
  0x12   : > { %p333_p3 = por %p332_p2, %p331_p1 }
  0x13   : > { %p329_p0 = pneg %p328_p13 }
  0x14   : > { %p335_p5 = por %p334_p4, %p333_p3 }
  0x16   : > { %p336_p6 = pnand %p335_p5, %p329_p0 }
  0x18   : > { %339 = shalt.err (!%p336_p6)
}
  0x19   : > { %s340_s7 = scalar_lea.vmem %s454_s26, 128  ;;  %s391_s8 = smov [#allocation2]  }
  0x1a   : > { %p341_p11 = scmp.ne.s32.totalorder %s454_s26, %s340_s7  ;;  %s345_s9 = sshll.u32 %s391_s8, 4  ;;  %s346_s9 = int_to_ptr.vmem [resolvable:$false] %s345_s9 }
  0x1b   : > { %s347_s15 = scalar_lea.vmem %s346_s9, 256  ;;  %p348_p10 = scmp.lt.s32.totalorder %s454_s26, %s346_s9 }
  0x1c   : > { %p343_p13 = pnand %p341_p11, %p327_p12  ;;  %p349_p1 = scmp.lt.s32.totalorder %s347_s15, %s340_s7 }
  0x1e   : > { %p344_p9 = pneg %p343_p13  ;;  %p350_p2 = por %p349_p1, %p348_p10 }
  0x20   : > { %p351_p3 = pnand %p350_p2, %p344_p9 }
  0x22   : > { %354 = shalt.err (!%p351_p3)
}
  0x23   : > { %291 = dma.hbm_to_vmem [thread:$0]  (!%p456_p8), %s452_s24, 128, %s454_s26, %s113_s28  }
  0x24   : > { %p522_p0 = scmp.lt.s32.totalorder %s389_s12, 3  ;;  %p523_p4 = scmp.ge.s32.totalorder %s389_s12, 1 }
  0x26   : > { %p129_p12 = pnand %p523_p4, %p522_p0 }
  0x27   : > { %s134_s16 = sand.u32 (!%p129_p12), 1, %s381_s10  }
  0x28   : > { %132 = sbr.rel (%p129_p12) target bundleno = 196 (0xc4), region = 24  ;;  %s281_s19 = sshll.u32 (!%p129_p12), %s134_s16, 3 }
  0x29   : > { %s135_s20 = scalar_lea.sflag (!%p129_p12), [#allocation3], %s134_s16  ;;  %s138_s21 = scalar_lea.vmem (!%p129_p12), [#allocation2], %s281_s19 }
  0x2f   : > { %372 = dma.done.wait (%p443_p7), %s135_s20, 128  }
  0x30   : > { %374 = vsyncadd (%p443_p7), %s135_s20, 4294967168  ;;  %v170_v0 = vld [vmem:[%s138_s21] sm:$0xff]  ;;  %p162_p8 = scmp.lt.s32.totalorder %s426_s13, 1  ;;  %vm173_vm0 = vcmask 7168  }
  0x31   : > { %175 = vadd.xlane.f32.xlu0 %v170_v0 }
  0x32   : > { %s529_s13 = smov (!%p162_p8, %s426_s13), 1 }
  0x33   : > { %s282_s12 = sshll.u32 %s529_s13, 3 }
  0x34   : > { %s169_s24 = scalar_lea.vmem %s519_s2, %s282_s12  ;;  %s165_s18 = scalar_lea.vmem %s518_s1, %s282_s12 }
  0x35   : > { %171 = vmax.xlane.f32.xlu0 %v170_v0 }
  0xbe   : > { %v176_v1 = vpop.xlane.xlu0 %175 }
  0xbf   : > { %v177_v2 = vmul.f32 0.0078125, %v176_v1 }
  0xc1   : > { %178 = vst.msk [vmem:[%s169_s24] sm:$0xff] %vm173_vm0, %v177_v2 }
  0xc2   : > { %v172_v3 = vpop.xlane.xlu0 %171 }
  0xc3   : > { %174 = vst.msk [vmem:[%s165_s18] sm:$0xff] %vm173_vm0, %v172_v3 }
  0xc4 PF: > { %p13_p7 = scmp.ge.s32.totalorder %s429_s14, 4   ;;  %s524_s9 = smov %s381_s10 }
  0xc5   : > { %s525_s10 = smov %s385_s11  ;;  %s526_s11 = smov %s439_s17 }
  0xc6   : > { %s527_s12 = smov %s429_s14  ;;  %15 = sbr.rel (!%p13_p7) target bundleno = 3 (0x3), region = 76 }
  0xcd   :  { %212 = vsyncpa [#allocation3], 1 }
  0xce   :  { %214 = vsyncpa [#allocation3 + $0x1], 1 }

</bundles_post_ra>
